<compile_context>
chip_gen: v6e
topology: v6e:2x2x1
jax: 0.10.0
libtpu: 0.0.40
codegen_flags: <defaults>
</compile_context>

<pallas_src>
import jax
import jax.numpy as jnp
from jax.experimental import pallas as pl
from jax.experimental.pallas import tpu as pltpu


def _round_up(x, m):
    return ((x + m - 1) // m) * m


def _chip_caps():
    """Per-generation tile caps, VMEM budgets and operand-dtype default."""
    try:
        kind = jax.devices()[0].device_kind.lower()
    except Exception:
        kind = ""
    if "v7" in kind:
        # 64 MiB physical VMEM / TC, 2 TensorCores, bf16 MXU.
        return dict(tm_cap=512, tn_cap=512, tk_cap=1024,
                    vmem_budget=28 << 20, vmem_limit=40 << 20,
                    two_core=True, bf16_default=True)
    if "v6" in kind:
        # 128 MiB VMEM, bf16 MXU at full rate.
        return dict(tm_cap=1024, tn_cap=512, tk_cap=2048,
                    vmem_budget=48 << 20, vmem_limit=80 << 20,
                    two_core=False, bf16_default=True)
    # v5e and unknown: 128 MiB VMEM but lowest HBM BW; keep f32 operands.
    return dict(tm_cap=512, tn_cap=256, tk_cap=2048,
                vmem_budget=32 << 20, vmem_limit=64 << 20,
                two_core=False, bf16_default=False)


def _pick_tile(total, cap, g):
    """Pick a tile for a dim of (g-aligned) size `total` under `cap`.

    Returns (tile, padded_total).  Prefers keeping the tile at the cap and
    zero-padding the dim up, unless an exact g-multiple divisor gives fewer
    grid steps (so e.g. N_pad=640 with cap 512 does not degrade to tn=128).
    """
    cap = max(g, (cap // g) * g)
    if total <= cap:
        return total, total
    # Candidate A: largest g-multiple divisor of `total` that is <= cap.
    div = g
    t = cap
    while t >= g:
        if total % t == 0:
            div = t
            break
        t -= g
    # Candidate B: tile at the cap, pad `total` up to a multiple of it.
    padded = _round_up(total, cap)
    if padded // cap < total // div:
        return cap, padded
    return div, total


def _fusion_kernel(x_ref, w_ref, b_ref, o_ref, acc_ref):
    """out = concat(x) @ W + b, K-tiled with an f32 accumulator."""
    k = pl.program_id(2)

    @pl.when(k == 0)
    def _():
        acc_ref[...] = jnp.zeros_like(acc_ref)

    # MXU matmul; operands may be bf16, accumulation stays f32.
    acc_ref[...] += jnp.dot(x_ref[...], w_ref[...],
                            preferred_element_type=jnp.float32)

    @pl.when(k == pl.num_programs(2) - 1)
    def _():
        # Bias epilogue exactly once per output tile (f32 VPU add).
        o_ref[...] = (acc_ref[...] + b_ref[...]).astype(o_ref.dtype)


def make_fusion_forward(weight, bias, operand_dtype=None):
    """Prepare (pad / cast) the fusion parameters once and return forward().

    weight: (sum(input_dims), output_dim)
    bias:   (output_dim,)
    Returns forward(modalities: list[(B, D_i)]) -> (B, output_dim).
    """
    caps = _chip_caps()
    if operand_dtype is None:
        operand_dtype = (jnp.bfloat16
                         if (caps["bf16_default"] and weight.dtype == jnp.float32)
                         else weight.dtype)
    op_item = jnp.dtype(operand_dtype).itemsize

    D_total, D_out = int(weight.shape[0]), int(weight.shape[1])

    # Lane-dense output: N padded to a multiple of 128.
    n128 = _round_up(max(D_out, 128), 128)
    tn, N_pad = _pick_tile(n128, caps["tn_cap"], 128)

    # K padded to a multiple of 128 (zero rows/cols contribute nothing);
    # K-tiling (extra "arbitrary" grid axis) only when D_total is large.
    k128 = _round_up(max(D_total, 128), 128)
    tk, K_pad = _pick_tile(k128, caps["tk_cap"], 128)
    nk = K_pad // tk

    # One-time parameter prep, hoisted out of the per-call hot path.
    w_pad = jnp.pad(weight, ((0, K_pad - D_total), (0, N_pad - D_out))
                    ).astype(operand_dtype)
    b_pad = jnp.pad(bias, (0, N_pad - D_out)).reshape(1, N_pad
                    ).astype(jnp.float32)

    def forward(modalities):
        out_dtype = modalities[0].dtype
        out_item = jnp.dtype(out_dtype).itemsize
        B = int(modalities[0].shape[0])
        tn_run = tn

        # ---- per-call M-tile selection under the double-buffered budget ----
        tm_max = min(caps["tm_cap"], _round_up(B, 8))
        cands = sorted({c for c in (tm_max, 1024, 512, 256, 128, 64, 32, 16, 8)
                        if 8 <= c <= tm_max}, reverse=True)
        tm = 8
        for cand in cands:
            need = (2 * op_item * (cand * tk + tk * tn_run)  # x + w tiles
                    + 2 * out_item * cand * tn_run           # output tile
                    + 2 * 4 * tn_run                         # bias (f32)
                    + 4 * cand * tn_run)                     # f32 accumulator
            if need <= caps["vmem_budget"]:
                tm = cand
                break
        B_pad = _round_up(B, tm)
        nb, nn = B_pad // tm, N_pad // tn_run

        # v7x: make sure both TensorCores get work if the shape allows it.
        if caps["two_core"] and nb * nn < 2:
            if tm >= 16 and B > tm // 2:
                tm //= 2
                B_pad = _round_up(B, tm)
            elif tn_run >= 256:
                tn_run //= 2
            nb, nn = B_pad // tm, N_pad // tn_run

        # ---- grid order: keep the heavier operand resident on the inner axis
        act_bytes = op_item * B_pad * K_pad
        w_bytes = op_item * K_pad * N_pad
        # Total HBM traffic (nk == 1 case): i-outer re-streams the weight
        # nb times; j-outer re-streams the activation nn times.
        weight_outer = (w_bytes + act_bytes * nn) < (act_bytes + w_bytes * nb)

        if weight_outer:                     # N tiles outer, B tiles inner
            grid = (nn, nb, nk)
            x_map = lambda j, i, k: (i, k)
            w_map = lambda j, i, k: (k, j)
            b_map = lambda j, i, k: (0, j)
            o_map = lambda j, i, k: (i, j)
        else:                                # B tiles outer, N tiles inner
            grid = (nb, nn, nk)
            x_map = lambda i, j, k: (i, k)
            w_map = lambda i, j, k: (k, j)
            b_map = lambda i, j, k: (0, j)
            o_map = lambda i, j, k: (i, j)

        # ---- per-call activation prep: concat + pad + cast ----
        x = (jnp.concatenate(modalities, axis=-1)
             if len(modalities) > 1 else modalities[0])
        x = jnp.pad(x, ((0, B_pad - B), (0, K_pad - D_total)))
        x = x.astype(operand_dtype)

        # Residency-aware, dtype-aware advisory cost estimate.
        if nk == 1:
            if weight_outer:
                x_traffic, w_traffic = act_bytes * nn, w_bytes
            else:
                x_traffic, w_traffic = act_bytes, w_bytes * nb
        else:
            x_traffic, w_traffic = act_bytes * nn, w_bytes * nb
        bytes_accessed = (x_traffic + w_traffic
                          + out_item * B_pad * N_pad + 4 * N_pad)
        flops = 2 * B_pad * K_pad * N_pad

        out = pl.pallas_call(
            _fusion_kernel,
            out_shape=jax.ShapeDtypeStruct((B_pad, N_pad), out_dtype),
            grid_spec=pltpu.PrefetchScalarGridSpec(
                num_scalar_prefetch=0,
                grid=grid,
                in_specs=[
                    pl.BlockSpec((tm, tk), x_map),
                    pl.BlockSpec((tk, tn_run), w_map),
                    pl.BlockSpec((1, tn_run), b_map),
                ],
                out_specs=pl.BlockSpec((tm, tn_run), o_map),
                scratch_shapes=[pltpu.VMEM((tm, tn_run), jnp.float32)],
            ),
            compiler_params=pltpu.CompilerParams(
                dimension_semantics=("parallel", "parallel", "arbitrary"),
                vmem_limit_bytes=caps["vmem_limit"],
            ),
            cost_estimate=pl.CostEstimate(
                flops=flops, transcendentals=0,
                bytes_accessed=bytes_accessed),
        )(x, w_pad, b_pad)

        return out[:B, :D_out]

    forward.operand_dtype = operand_dtype
    return forward


if __name__ == "__main__":
    # Interface config: 3 modalities with these feature dims, fused to 64.
    input_dims = [32, 48, 16]
    output_dim = 64
    batch = 8

    key = jax.random.PRNGKey(0)
    keys = jax.random.split(key, len(input_dims) + 2)

    modalities = [
        jax.random.normal(keys[i], (batch, d), dtype=jnp.float32)
        for i, d in enumerate(input_dims)
    ]
    d_total = sum(input_dims)
    weight = (jax.random.normal(keys[-2], (d_total, output_dim),
                                dtype=jnp.float32)
              * (1.0 / jnp.sqrt(d_total)))
    bias = jax.random.normal(keys[-1], (output_dim,), dtype=jnp.float32) * 0.01

    forward = make_fusion_forward(weight, bias)
    out = jax.block_until_ready(forward(modalities))

    # Pure-JAX reference at the same operand precision (f32 accumulation in
    # both paths; bf16 operands on v6e/v7x so tolerance accounts only for
    # accumulation-order differences).
    op_dt = forward.operand_dtype
    x_ref = jnp.concatenate(modalities, axis=-1).astype(op_dt).astype(jnp.float32)
    w_ref = weight.astype(op_dt).astype(jnp.float32)
    ref = x_ref @ w_ref + bias

    assert out.shape == (batch, output_dim)
    assert jnp.allclose(out.astype(jnp.float32), ref, atol=1e-2, rtol=1e-2), (
        float(jnp.max(jnp.abs(out.astype(jnp.float32) - ref))))

    print("KERNEL_OK")
</pallas_src>

<mosaic_0001>
module attributes {stable_mosaic.version = 11 : i64} {
  func.func @_fusion_kernel(%arg0: i32, %arg1: i32, %arg2: i32, %arg3: memref<8x128xf32, #tpu.memory_space<vmem>>, %arg4: memref<128x128xf32, #tpu.memory_space<vmem>>, %arg5: memref<1x128xf32, #tpu.memory_space<vmem>>, %arg6: memref<8x128xf32, #tpu.memory_space<vmem>>, %arg7: memref<8x128xf32, #tpu.memory_space<vmem>>) attributes {dimension_semantics = [#tpu.dimension_semantics<parallel>, #tpu.dimension_semantics<parallel>, #tpu.dimension_semantics<arbitrary>], iteration_bounds = array<i64: 1, 1, 1>, scalar_prefetch = 0 : i64, scratch_operands = 1 : i64, tpu.core_type = #tpu.core_type<tc>, window_params = [{transform_indices = @transform_0, window_bounds = array<i64: 8, 128>}, {transform_indices = @transform_1, window_bounds = array<i64: 128, 128>}, {transform_indices = @transform_2, window_bounds = array<i64: 1, 128>}, {transform_indices = @transform_3, window_bounds = array<i64: 8, 128>}]} {
    %c0_i32 = arith.constant 0 : i32
    %0 = arith.cmpi eq, %arg2, %c0_i32 : i32
    %1 = arith.extui %0 : i1 to i32
    %c0_i32_0 = arith.constant 0 : i32
    %2 = arith.cmpi ne, %1, %c0_i32_0 : i32
    scf.if %2 {
      %cst_10 = arith.constant 0.000000e+00 : f32
      %12 = vector.broadcast %cst_10 : f32 to vector<8x128xf32>
      %c0_11 = arith.constant 0 : index
      %c0_12 = arith.constant 0 : index
      %13 = vector.load %arg7[%c0_11, %c0_12] : memref<8x128xf32, #tpu.memory_space<vmem>>, vector<8x128xf32>
      tpu.vector_store %arg7[%c0_11, %c0_12], %12 {strides = array<i32>} : memref<8x128xf32, #tpu.memory_space<vmem>>, vector<8x128xf32>,
    } else {
    }
    %c0 = arith.constant 0 : index
    %c0_1 = arith.constant 0 : index
    %3 = vector.load %arg7[%c0, %c0_1] : memref<8x128xf32, #tpu.memory_space<vmem>>, vector<8x128xf32>
    %c0_2 = arith.constant 0 : index
    %c0_3 = arith.constant 0 : index
    %4 = vector.load %arg3[%c0_2, %c0_3] : memref<8x128xf32, #tpu.memory_space<vmem>>, vector<8x128xf32>
    %c0_4 = arith.constant 0 : index
    %c0_5 = arith.constant 0 : index
    %5 = vector.load %arg4[%c0_4, %c0_5] : memref<128x128xf32, #tpu.memory_space<vmem>>, vector<128x128xf32>
    %cst = arith.constant dense<0.000000e+00> : vector<8x128xf32>
    %6 = tpu.matmul %4, %5, %cst {dimension_numbers = #tpu.dot_dimension_numbers<[1], [0], [0], [1], [0, 0, 1, 1], [], []>} : vector<8x128xf32>, vector<128x128xf32>, vector<8x128xf32> -> vector<8x128xf32>
    %7 = arith.addf %3, %6 : vector<8x128xf32>
    %c0_6 = arith.constant 0 : index
    %c0_7 = arith.constant 0 : index
    %8 = vector.load %arg7[%c0_6, %c0_7] : memref<8x128xf32, #tpu.memory_space<vmem>>, vector<8x128xf32>
    tpu.vector_store %arg7[%c0_6, %c0_7], %7 {strides = array<i32>} : memref<8x128xf32, #tpu.memory_space<vmem>>, vector<8x128xf32>,
    %c0_i32_8 = arith.constant 0 : i32
    %9 = arith.cmpi eq, %arg2, %c0_i32_8 : i32
    %10 = arith.extui %9 : i1 to i32
    %c0_i32_9 = arith.constant 0 : i32
    %11 = arith.cmpi ne, %10, %c0_i32_9 : i32
    scf.if %11 {
      %c0_10 = arith.constant 0 : index
      %c0_11 = arith.constant 0 : index
      %12 = vector.load %arg7[%c0_10, %c0_11] : memref<8x128xf32, #tpu.memory_space<vmem>>, vector<8x128xf32>
      %c0_12 = arith.constant 0 : index
      %c0_13 = arith.constant 0 : index
      %13 = vector.load %arg5[%c0_12, %c0_13] : memref<1x128xf32, #tpu.memory_space<vmem>>, vector<1x128xf32>
      %14 = vector.broadcast %13 : vector<1x128xf32> to vector<8x128xf32>
      %15 = arith.addf %12, %14 : vector<8x128xf32>
      %c0_14 = arith.constant 0 : index
      %c0_15 = arith.constant 0 : index
      %16 = vector.load %arg6[%c0_14, %c0_15] : memref<8x128xf32, #tpu.memory_space<vmem>>, vector<8x128xf32>
      tpu.vector_store %arg6[%c0_14, %c0_15], %15 {strides = array<i32>} : memref<8x128xf32, #tpu.memory_space<vmem>>, vector<8x128xf32>,
    } else {
    }
    return
  }
  func.func @transform_0(%arg0: i32, %arg1: i32, %arg2: i32) -> (i32, i32) {
    %c0_i32 = arith.constant 0 : i32
    return %arg0, %arg2 : i32, i32
  }
  func.func @transform_1(%arg0: i32, %arg1: i32, %arg2: i32) -> (i32, i32) {
    %c0_i32 = arith.constant 0 : i32
    return %arg2, %arg1 : i32, i32
  }
  func.func @transform_2(%arg0: i32, %arg1: i32, %arg2: i32) -> (i32, i32) {
    %c0_i32 = arith.constant 0 : i32
    %c0_i32_0 = arith.constant 0 : i32
    return %c0_i32, %arg1 : i32, i32
  }
  func.func @transform_3(%arg0: i32, %arg1: i32, %arg2: i32) -> (i32, i32) {
    %c0_i32 = arith.constant 0 : i32
    return %arg0, %arg1 : i32, i32
  }
}

</mosaic_0001>

<bundles_post_ra>
// kernel: tpu_custom_call.1
= control target key start
LH: loop header
LB: loop body
LE: loop exit
PB: predicated region body
PF: predicated region fallthrough
CT: control target
= control target key end

     0   :  { %8 = vsyncpa [#allocation4], 0  ;;  %s330_s0 = inlined_call_operand.hbm [shape: f32[8,128], index: 0, kind: input, shape index: {}]   ;;  %s331_s1 = inlined_call_operand.hbm [shape: f32[128,128], index: 1, kind: input, shape index: {}]   ;;  %s332_s2 = inlined_call_operand.vmem [shape: f32[1,128], index: 2, kind: input, shape index: {}]   ;;  %s333_s3 = inlined_call_operand.hbm [shape: f32[8,128], index: 3, kind: output, shape index: {}]  }
   0x1   :  { %9 = vsyncpa [#allocation7], 0 }
   0x2   :  { %10 = vsyncpa [#allocation5], 0  ;;  %s291_s12 = smov [#allocation3]   ;;  %s292_s14 = smov [#allocation6]  }
   0x3   :  { %s17_s13 = sshll.u32 %s291_s12, 4  ;;  %s26_s15 = sshll.u32 %s292_s14, 4  ;;  %s18_s13 = int_to_ptr.vmem [resolvable:$true] %s17_s13  ;;  %s27_s15 = int_to_ptr.vmem [resolvable:$true] %s26_s15 }
   0x4   :  { %s233_s16 = scalar_lea.vmem %s18_s13, 128  ;;  %p238_p1 = scmp.lt.s32.totalorder %s18_s13, %s18_s13 }
   0x5   :  { %p234_p0 = scmp.ne.s32.totalorder %s18_s13, %s233_s16  ;;  %p239_p2 = scmp.lt.s32.totalorder %s233_s16, %s233_s16 }
   0x7   :  { %p240_p3 = por %p239_p2, %p238_p1 }
   0x9   :  { %p241_p4 = pnand %p240_p3, %p234_p0 }
   0xb   :  { %244 = shalt.err (!%p241_p4)
}
   0xc   :  { %20 = dma.hbm_to_vmem [thread:$0]  %s330_s0, 128, %s18_s13, [#allocation4]  }
   0xd   :  { %s253_s19 = scalar_lea.vmem %s27_s15, 2048  ;;  %p258_p6 = scmp.lt.s32.totalorder %s27_s15, %s27_s15 }
   0xe   :  { %p254_p5 = scmp.ne.s32.totalorder %s27_s15, %s253_s19  ;;  %p259_p7 = scmp.lt.s32.totalorder %s253_s19, %s253_s19 }
  0x10   :  { %p260_p8 = por %p259_p7, %p258_p6 }
  0x12   :  { %p261_p9 = pnand %p260_p8, %p254_p5 }
  0x14   :  { %264 = shalt.err (!%p261_p9)
}
  0x15   :  { %s293_s20 = smov 128   ;;  %s294_s21 = smov 8  }
  0x16   :  { %32 = dma.hbm_to_vmem [thread:$0]  %s331_s1, 2048, %s27_s15, [#allocation7], %s293_s20, %s293_s20, %s294_s21  }
  0x17   :  { %285 = dma.done.wait [#allocation4], 128  }
  0x18   :  { %286 = vsyncadd [#allocation4], 4294967168 }
  0x19   :  { %287 = dma.done.wait [#allocation7], 2048  }
  0x1a   :  { %288 = vsyncadd [#allocation7], 4294965248  ;;  %v295_v0 = vmov 0.0   ;;  %vm296_vm0 = vmmov 0   ;;  %v63_v1 = vld [vmem:[#allocation6 + $0x78] sm:$0xff]  ;;  %v62_v2 = vld [vmem:[#allocation6 + $0x70] sm:$0xff] }
  0x1b   :  { %183 = vmatprep.subr.mxu0 %v295_v0  ;;  %215 = vmatprep.mubr.msk.f32.mxu0 %vm296_vm0, %v295_v0  ;;  %v61_v3 = vld [vmem:[#allocation6 + $0x68] sm:$0xff]  ;;  %v60_v4 = vld [vmem:[#allocation6 + $0x60] sm:$0xff]  ;;  %v59_v5 = vld [vmem:[#allocation6 + $0x58] sm:$0xff]  ;;  %s297_s24 = smov [#allocation8]  }
  0x1c   :  { %184 = vmatpush3.msra.mxu0 %v63_v1  ;;  %v58_v6 = vld [vmem:[#allocation6 + $0x50] sm:$0xff]  ;;  %v57_v7 = vld [vmem:[#allocation6 + $0x48] sm:$0xff]  ;;  %v56_v8 = vld [vmem:[#allocation6 + $0x40] sm:$0xff]  ;;  %s155_s25 = sshll.u32 %s297_s24, 4  ;;  %s156_s25 = int_to_ptr.vmem [resolvable:$true] %s155_s25 }
  0x1d   :  { %185 = vmatprep.subr.mxu0 %v295_v0  ;;  %v55_v9 = vld [vmem:[#allocation6 + $0x38] sm:$0xff]  ;;  %v54_v10 = vld [vmem:[#allocation6 + $0x30] sm:$0xff]  ;;  %v53_v11 = vld [vmem:[#allocation6 + $0x28] sm:$0xff]  ;;  %s265_s26 = scalar_lea.vmem %s156_s25, 128  ;;  %p270_p11 = scmp.lt.s32.totalorder %s156_s25, %s156_s25 }
  0x1e   :  { %186 = vmatpush3.msra.mxu0 %v62_v2  ;;  %v52_v12 = vld [vmem:[#allocation6 + $0x20] sm:$0xff]  ;;  %v51_v13 = vld [vmem:[#allocation6 + $0x18] sm:$0xff]  ;;  %v50_v14 = vld [vmem:[#allocation6 + $0x10] sm:$0xff]  ;;  %p266_p10 = scmp.ne.s32.totalorder %s156_s25, %s265_s26  ;;  %p271_p12 = scmp.lt.s32.totalorder %s265_s26, %s265_s26 }
  0x1f   :  { %187 = vmatprep.subr.mxu0 %v295_v0  ;;  %v49_v15 = vld [vmem:[#allocation6 + $0x8] sm:$0xff]  ;;  %v48_v16 = vld [vmem:[#allocation6] sm:$0xff]  ;;  %v47_v17 = vld [vmem:[#allocation3] sm:$0xff] }
  0x20   :  { %188 = vmatpush3.msra.mxu0 %v61_v3  ;;  %v165_v18 = vld [vmem:[%s332_s2] ss:$0 sm:$0xff]  ;;  %p272_p13 = por %p271_p12, %p270_p11 }
  0x21   :  { %189 = vmatprep.subr.mxu0 %v295_v0 }
  0x22   :  { %190 = vmatpush3.msra.mxu0 %v60_v4  ;;  %p273_p0 = pnand %p272_p13, %p266_p10 }
  0x23   :  { %191 = vmatprep.subr.mxu0 %v295_v0 }
  0x24   :  { %192 = vmatpush3.msra.mxu0 %v59_v5 }
  0x25   :  { %193 = vmatprep.subr.mxu0 %v295_v0 }
  0x26   :  { %194 = vmatpush3.msra.mxu0 %v58_v6 }
  0x27   :  { %195 = vmatprep.subr.mxu0 %v295_v0 }
  0x28   :  { %196 = vmatpush3.msra.mxu0 %v57_v7 }
  0x29   :  { %197 = vmatprep.subr.mxu0 %v295_v0 }
  0x2a   :  { %198 = vmatpush3.msra.mxu0 %v56_v8 }
  0x2b   :  { %199 = vmatprep.subr.mxu0 %v295_v0 }
  0x2c   :  { %200 = vmatpush3.msra.mxu0 %v55_v9 }
  0x2d   :  { %201 = vmatprep.subr.mxu0 %v295_v0 }
  0x2e   :  { %202 = vmatpush3.msra.mxu0 %v54_v10 }
  0x2f   :  { %203 = vmatprep.subr.mxu0 %v295_v0 }
  0x30   :  { %204 = vmatpush3.msra.mxu0 %v53_v11 }
  0x31   :  { %205 = vmatprep.subr.mxu0 %v295_v0 }
  0x32   :  { %206 = vmatpush3.msra.mxu0 %v52_v12 }
  0x33   :  { %207 = vmatprep.subr.mxu0 %v295_v0 }
  0x34   :  { %208 = vmatpush3.msra.mxu0 %v51_v13 }
  0x35   :  { %209 = vmatprep.subr.mxu0 %v295_v0 }
  0x36   :  { %210 = vmatpush3.msra.mxu0 %v50_v14 }
  0x37   :  { %211 = vmatprep.subr.mxu0 %v295_v0 }
  0x38   :  { %212 = vmatpush3.msra.mxu0 %v49_v15 }
  0x39   :  { %213 = vmatprep.subr.mxu0 %v295_v0 }
  0x3a   :  { %214 = vmatpush3.msra.mxu0 %v48_v16 }
  0x3b   :  { %216 = vmatmul.mubr.f32.vlgmr.msra.gmra.mxu0 %v47_v17 }
  0xfb   :  { %v130_v19 = vpop.f32.mrf.mxu0 }
  0xfc   :  { %v147_v20 = vadd.f32 %v165_v18, %v130_v19 }
  0xfd   :  { %v217_v21 = vpop.f32.mrf.mxu0 }
  0xfe   :  { %148 = vst [vmem:[#allocation8] sm:$0xff] %v147_v20 }
  0xff   :  { %276 = shalt.err (!%p273_p0)
}
 0x100   :  { %158 = dma.vmem_to_hbm [thread:$0]  %s156_s25, 128, %s333_s3, [#allocation5]  }
 0x101   :  { %289 = dma.done.wait [#allocation5], 128  }
 0x102   :  { %290 = vsyncadd [#allocation5], 4294967168 }
 0x103   :  { %162 = vsyncpa [#allocation4], 1 }
 0x104   :  { %163 = vsyncpa [#allocation7], 1 }
 0x105   :  { %164 = vsyncpa [#allocation5], 1 }

</bundles_post_ra>
